<compile_context>
chip_gen: v5e
topology: v5e:2x2
jax: 0.10.0
libtpu: 0.0.40
codegen_flags: <defaults>
</compile_context>

<pallas_src>
import functools

import jax
import jax.numpy as jnp
from jax import lax
from jax.experimental import pallas as pl
from jax.experimental.pallas import tpu as pltpu


LANE = 128
SUB = 8


def _round_up(x, m):
    return ((x + m - 1) // m) * m


def _attn_kernel(y_ref, wq_ref, bq_ref, wkv_ref, bkv_ref, wo_ref, bo_ref,
                 o_ref, k_sc, v_sc, *, Rq, Kp, scale, op_dtype):
    """Grid = (batch, q_block).  One step computes output rows
    [qi*Rq, (qi+1)*Rq) of one batch element.  K/V for the whole batch element
    are projected once (qi == 0) into VMEM scratch and reused across q-blocks.
    """
    qi = pl.program_id(1)

    # ---- K/V projection: once per batch element (scratch persists over qi).
    @pl.when(qi == 0)
    def _():
        yb = y_ref[...].astype(op_dtype)                    # (Tpad, Hp)
        kv = jnp.dot(yb, wkv_ref[...],
                     preferred_element_type=jnp.float32)    # (Tpad, Kp+Vp)
        kv = kv + bkv_ref[...]                              # bias in f32
        k_sc[...] = kv[:, :Kp].astype(k_sc.dtype)
        v_sc[...] = kv[:, Kp:].astype(v_sc.dtype)

    # ---- Q projection for this query-row block only.
    row0 = pl.multiple_of(qi * Rq, Rq)
    yq = y_ref[pl.ds(row0, Rq), :].astype(op_dtype)         # (Rq, Hp)
    q = jnp.dot(yq, wq_ref[...], preferred_element_type=jnp.float32)
    q = (q + bq_ref[...]) * scale                           # bias + 1/sqrt(Kd) in f32

    # ---- Scores against this batch's keys (contract last dims, no transpose).
    k = k_sc[...]                                           # (Tpad, Kp)
    s = lax.dot_general(q.astype(op_dtype), k, (((1,), (1,)), ((), ())),
                        preferred_element_type=jnp.float32)  # (Rq, Tpad)

    # Plain causal mask within the batch (padded key rows are never unmasked
    # for valid query rows since col <= row < T).
    tpad = k.shape[0]
    rows = row0 + lax.broadcasted_iota(jnp.int32, (Rq, tpad), 0)
    cols = lax.broadcasted_iota(jnp.int32, (Rq, tpad), 1)
    s = jnp.where(cols <= rows, s, jnp.float32(-1e30))

    # ---- Softmax (f32); normalize AFTER the PV matmul (small (Rq, Vp) scale).
    m = jnp.max(s, axis=-1, keepdims=True)
    p = jnp.exp(s - m)
    l = jnp.sum(p, axis=-1, keepdims=True)

    o = jnp.dot(p.astype(op_dtype), v_sc[...],
                preferred_element_type=jnp.float32)          # (Rq, Vp)
    o = o * pl.reciprocal(l, approx=False)                   # exact normalization

    # ---- Output projection (Wo pre-transposed in the wrapper).
    out = jnp.dot(o.astype(op_dtype), wo_ref[...],
                  preferred_element_type=jnp.float32)        # (Rq, Hp)
    out = out + bo_ref[...]
    o_ref[...] = out.astype(o_ref.dtype)


def prepare_params(wq, bq, wk, bk, wv, bv, wo, bo, *, mxu_dtype=None):
    """One-time weight preparation (hoisted off the per-call path).

    Weights are PyTorch nn.Linear layout: (out, in) + (out,).  They are
    transposed, zero-padded to lane-dense widths, and K/V are fused into one
    weight so the per-batch projection is a single MXU matmul.  Biases stay in
    f32; matmul operands are optionally cast to mxu_dtype (e.g. bf16).
    """
    Kd, H = wq.shape
    Vd = wv.shape[0]
    f32 = jnp.float32
    wdt = f32 if mxu_dtype is None else mxu_dtype

    Hp = _round_up(H, LANE)
    Kp = _round_up(Kd, LANE)
    Vp = _round_up(Vd, LANE)

    def pad2(a, shape, dtype):
        return jnp.zeros(shape, dtype).at[:a.shape[0], :a.shape[1]].set(
            a.astype(dtype))

    return dict(
        w_q=pad2(wq.T, (Hp, Kp), wdt),
        b_q=pad2(bq[None, :], (1, Kp), f32),
        w_kv=jnp.concatenate([pad2(wk.T, (Hp, Kp), wdt),
                              pad2(wv.T, (Hp, Vp), wdt)], axis=1),
        b_kv=jnp.concatenate([pad2(bk[None, :], (1, Kp), f32),
                              pad2(bv[None, :], (1, Vp), f32)], axis=1),
        w_o=pad2(wo.T, (Vp, Hp), wdt),
        b_o=pad2(bo[None, :], (1, Hp), f32),
        dims=(H, Kd, Vd, Hp, Kp, Vp),
        mxu_dtype=mxu_dtype,
    )


def self_attention(y_all, params, *, q_block=128):
    """Causal self-attention matching PyTorch SelfAttention.forward.

    y_all: (B, T, H) at the model dtype.  params: output of prepare_params.
    q_block: query-row block size (clamped to the padded sequence length).
    """
    B, T, H = y_all.shape
    H_p, Kd, Vd, Hp, Kp, Vp = params["dims"]
    assert H == H_p, "hidden dim mismatch with prepared params"
    in_dtype = y_all.dtype
    f32 = jnp.float32
    mxu_dtype = params["mxu_dtype"]
    op_dtype = f32 if mxu_dtype is None else mxu_dtype
    scale = 1.0 / float(Kd) ** 0.5

    Rq = min(_round_up(q_block, SUB), _round_up(T, SUB))
    Tpad = _round_up(T, Rq)
    Gq = Tpad // Rq

    # Keep HBM I/O at the model dtype; pad rows to Tpad and hidden to Hp.
    y_pad = jnp.zeros((B, Tpad, Hp), in_dtype).at[:, :T, :H].set(y_all)

    kernel = functools.partial(_attn_kernel, Rq=Rq, Kp=Kp, scale=scale,
                               op_dtype=op_dtype)

    def full2(shape):
        return pl.BlockSpec(shape, lambda b, qi: (0, 0))

    # Explicit VMEM budget for the tiles we actually use (with headroom).
    in_bytes = jnp.dtype(in_dtype).itemsize
    op_bytes = jnp.dtype(op_dtype).itemsize
    need = (2 * Tpad * Hp * in_bytes                       # resident y block
            + Tpad * (Kp + Vp) * op_bytes                  # K/V scratch
            + 2 * Rq * Hp * in_bytes                       # output block
            + 2 * Rq * Tpad * 4                            # score / exp tiles
            + 2 * (Hp * (2 * Kp + Vp) + Vp * Hp) * op_bytes)  # weights
    vmem_limit = int(min(100 * 2**20, max(32 * 2**20, 2 * need)))

    out = pl.pallas_call(
        kernel,
        out_shape=jax.ShapeDtypeStruct((B, Tpad, Hp), in_dtype),
        grid_spec=pltpu.PrefetchScalarGridSpec(
            num_scalar_prefetch=0,
            grid=(B, Gq),
            in_specs=[
                # This batch element's rows only (resident across q-blocks).
                pl.BlockSpec((None, Tpad, Hp), lambda b, qi: (b, 0, 0)),
                full2((Hp, Kp)),           # Wq (pre-transposed, scaled post-matmul)
                full2((1, Kp)),            # bq
                full2((Hp, Kp + Vp)),      # fused Wk|Wv (pre-transposed)
                full2((1, Kp + Vp)),       # fused bk|bv
                full2((Vp, Hp)),           # Wo (pre-transposed)
                full2((1, Hp)),            # bo
            ],
            out_specs=pl.BlockSpec((None, Rq, Hp), lambda b, qi: (b, qi, 0)),
            scratch_shapes=[
                pltpu.VMEM((Tpad, Kp), op_dtype),   # K for this batch element
                pltpu.VMEM((Tpad, Vp), op_dtype),   # V for this batch element
            ],
        ),
        compiler_params=pltpu.CompilerParams(
            # Megacore: disjoint batches per TensorCore; q-blocks sequential
            # so the K/V scratch computed at qi == 0 is reused.
            dimension_semantics=("parallel", "arbitrary"),
            vmem_limit_bytes=vmem_limit),
    )(y_pad, params["w_q"], params["b_q"], params["w_kv"], params["b_kv"],
      params["w_o"], params["b_o"])

    return out[:, :T, :H]


def self_attention_ref(y_all, wq, bq, wk, bk, wv, bv, wo, bo):
    """Pure-JAX reference mirroring the PyTorch forward (loop over timesteps)."""
    B, T, H = y_all.shape
    Kd = wq.shape[0]
    outs = []
    for i in range(T):
        y = y_all[:, :i + 1]                                 # (B, i+1, H)
        q = y[:, -1:] @ wq.T + bq                            # (B, 1, Kd)
        k = y @ wk.T + bk                                    # (B, i+1, Kd)
        v = y @ wv.T + bv                                    # (B, i+1, Vd)
        q = q / (Kd ** 0.5)
        s = q @ jnp.swapaxes(k, -1, -2)                      # (B, 1, i+1)
        w = jax.nn.softmax(s, axis=-1)
        o = w @ v                                            # (B, 1, Vd)
        out = (o @ wo.T + bo)[:, 0]                          # (B, H)
        outs.append(out[:, None])
    return jnp.concatenate(outs, axis=1)


if __name__ == "__main__":
    B, T, H = 2, 8, 32
    Kd, Vd = 16, 16

    key = jax.random.PRNGKey(0)
    keys = jax.random.split(key, 9)
    y_all = jax.random.normal(keys[0], (B, T, H), dtype=jnp.float32)

    # Deterministic parameter init (nn.Linear layout: (out, in) weight + (out,) bias)
    def init_linear(kw, kb, out_dim, in_dim):
        bound = 1.0 / (in_dim ** 0.5)
        w = jax.random.uniform(kw, (out_dim, in_dim), jnp.float32, -bound, bound)
        b = jax.random.uniform(kb, (out_dim,), jnp.float32, -bound, bound)
        return w, b

    wq, bq = init_linear(keys[1], keys[2], Kd, H)
    wk, bk = init_linear(keys[3], keys[4], Kd, H)
    wv, bv = init_linear(keys[5], keys[6], Vd, H)
    wo, bo = init_linear(keys[7], keys[8], H, Vd)

    # One-time weight prep (hoisted off the per-call path).
    params = prepare_params(wq, bq, wk, bk, wv, bv, wo, bo, mxu_dtype=None)

    out = self_attention(y_all, params)
    out = jax.block_until_ready(out)

    ref = self_attention_ref(y_all, wq, bq, wk, bk, wv, bv, wo, bo)
    assert out.shape == (B, T, H)
    max_err = float(jnp.max(jnp.abs(out - ref)))
    assert jnp.allclose(out, ref, atol=1e-4, rtol=1e-4), \
        f"mismatch vs reference (max abs err {max_err})"

    print("KERNEL_OK")
</pallas_src>

<mosaic_0001>
module attributes {stable_mosaic.version = 11 : i64} {
  func.func @_attn_kernel(%arg0: i32, %arg1: i32, %arg2: memref<1x8x128xf32, #tpu.memory_space<vmem>>, %arg3: memref<128x128xf32, #tpu.memory_space<vmem>>, %arg4: memref<1x128xf32, #tpu.memory_space<vmem>>, %arg5: memref<128x256xf32, #tpu.memory_space<vmem>>, %arg6: memref<1x256xf32, #tpu.memory_space<vmem>>, %arg7: memref<128x128xf32, #tpu.memory_space<vmem>>, %arg8: memref<1x128xf32, #tpu.memory_space<vmem>>, %arg9: memref<1x8x128xf32, #tpu.memory_space<vmem>>, %arg10: memref<8x128xf32, #tpu.memory_space<vmem>>, %arg11: memref<8x128xf32, #tpu.memory_space<vmem>>) attributes {dimension_semantics = [#tpu.dimension_semantics<parallel>, #tpu.dimension_semantics<arbitrary>], iteration_bounds = array<i64: 2, 1>, scalar_prefetch = 0 : i64, scratch_operands = 2 : i64, tpu.core_type = #tpu.core_type<tc>, window_params = [{transform_indices = @transform_0, window_bounds = array<i64: 1, 8, 128>}, {pipeline_mode = #tpu.pipeline_mode<synchronous>, transform_indices = @transform_1, window_bounds = array<i64: 128, 128>}, {pipeline_mode = #tpu.pipeline_mode<synchronous>, transform_indices = @transform_2, window_bounds = array<i64: 1, 128>}, {pipeline_mode = #tpu.pipeline_mode<synchronous>, transform_indices = @transform_3, window_bounds = array<i64: 128, 256>}, {pipeline_mode = #tpu.pipeline_mode<synchronous>, transform_indices = @transform_4, window_bounds = array<i64: 1, 256>}, {pipeline_mode = #tpu.pipeline_mode<synchronous>, transform_indices = @transform_5, window_bounds = array<i64: 128, 128>}, {pipeline_mode = #tpu.pipeline_mode<synchronous>, transform_indices = @transform_6, window_bounds = array<i64: 1, 128>}, {transform_indices = @transform_7, window_bounds = array<i64: 1, 8, 128>}]} {
    %c0_i32 = arith.constant 0 : i32
    %0 = arith.cmpi eq, %arg1, %c0_i32 : i32
    %1 = arith.extui %0 : i1 to i32
    %c0_i32_0 = arith.constant 0 : i32
    %2 = arith.cmpi ne, %1, %c0_i32_0 : i32
    scf.if %2 {
      %c0_24 = arith.constant 0 : index
      %c0_25 = arith.constant 0 : index
      %c0_26 = arith.constant 0 : index
      %44 = vector.load %arg2[%c0_24, %c0_25, %c0_26] : memref<1x8x128xf32, #tpu.memory_space<vmem>>, vector<1x8x128xf32>
      %45 = vector.shape_cast %44 : vector<1x8x128xf32> to vector<8x128xf32>
      %c0_27 = arith.constant 0 : index
      %c0_28 = arith.constant 0 : index
      %46 = vector.load %arg5[%c0_27, %c0_28] : memref<128x256xf32, #tpu.memory_space<vmem>>, vector<128x256xf32>
      %cst_29 = arith.constant dense<0.000000e+00> : vector<8x256xf32>
      %47 = tpu.matmul %45, %46, %cst_29 {dimension_numbers = #tpu.dot_dimension_numbers<[1], [0], [0], [1], [0, 0, 1, 1], [], []>} : vector<8x128xf32>, vector<128x256xf32>, vector<8x256xf32> -> vector<8x256xf32>
      %c0_30 = arith.constant 0 : index
      %c0_31 = arith.constant 0 : index
      %48 = vector.load %arg6[%c0_30, %c0_31] : memref<1x256xf32, #tpu.memory_space<vmem>>, vector<1x256xf32>
      %49 = vector.broadcast %48 : vector<1x256xf32> to vector<8x256xf32>
      %50 = arith.addf %47, %49 : vector<8x256xf32>
      %51 = vector.extract_strided_slice %50 {offsets = [0, 0], sizes = [8, 128], strides = [1, 1]} : vector<8x256xf32> to vector<8x128xf32>
      %c0_32 = arith.constant 0 : index
      %c0_33 = arith.constant 0 : index
      %52 = vector.load %arg10[%c0_32, %c0_33] : memref<8x128xf32, #tpu.memory_space<vmem>>, vector<8x128xf32>
      tpu.vector_store %arg10[%c0_32, %c0_33], %51 {strides = array<i32>} : memref<8x128xf32, #tpu.memory_space<vmem>>, vector<8x128xf32>,
      %53 = vector.extract_strided_slice %50 {offsets = [0, 128], sizes = [8, 128], strides = [1, 1]} : vector<8x256xf32> to vector<8x128xf32>
      %c0_34 = arith.constant 0 : index
      %c0_35 = arith.constant 0 : index
      %54 = vector.load %arg11[%c0_34, %c0_35] : memref<8x128xf32, #tpu.memory_space<vmem>>, vector<8x128xf32>
      tpu.vector_store %arg11[%c0_34, %c0_35], %53 {strides = array<i32>} : memref<8x128xf32, #tpu.memory_space<vmem>>, vector<8x128xf32>,
    } else {
    }
    %c8_i32 = arith.constant 8 : i32
    %3 = arith.muli %arg1, %c8_i32 : i32
    %4 = tpu.assume_multiple %3, 8 : i32
    %c0 = arith.constant 0 : index
    %5 = arith.index_cast %4 : i32 to index
    %c0_1 = arith.constant 0 : index
    %6 = vector.load %arg2[%c0, %5, %c0_1] : memref<1x8x128xf32, #tpu.memory_space<vmem>>, vector<1x8x128xf32>
    %7 = vector.shape_cast %6 : vector<1x8x128xf32> to vector<8x128xf32>
    %c0_2 = arith.constant 0 : index
    %c0_3 = arith.constant 0 : index
    %8 = vector.load %arg3[%c0_2, %c0_3] : memref<128x128xf32, #tpu.memory_space<vmem>>, vector<128x128xf32>
    %cst = arith.constant dense<0.000000e+00> : vector<8x128xf32>
    %9 = tpu.matmul %7, %8, %cst {dimension_numbers = #tpu.dot_dimension_numbers<[1], [0], [0], [1], [0, 0, 1, 1], [], []>} : vector<8x128xf32>, vector<128x128xf32>, vector<8x128xf32> -> vector<8x128xf32>
    %c0_4 = arith.constant 0 : index
    %c0_5 = arith.constant 0 : index
    %10 = vector.load %arg4[%c0_4, %c0_5] : memref<1x128xf32, #tpu.memory_space<vmem>>, vector<1x128xf32>
    %11 = vector.broadcast %10 : vector<1x128xf32> to vector<8x128xf32>
    %12 = arith.addf %9, %11 : vector<8x128xf32>
    %cst_6 = arith.constant 2.500000e-01 : f32
    %13 = vector.broadcast %cst_6 : f32 to vector<8x128xf32>
    %14 = arith.mulf %12, %13 : vector<8x128xf32>
    %c0_7 = arith.constant 0 : index
    %c0_8 = arith.constant 0 : index
    %15 = vector.load %arg10[%c0_7, %c0_8] : memref<8x128xf32, #tpu.memory_space<vmem>>, vector<8x128xf32>
    %cst_9 = arith.constant dense<0.000000e+00> : vector<8x8xf32>
    %16 = tpu.matmul %14, %15, %cst_9 {dimension_numbers = #tpu.dot_dimension_numbers<[1], [1], [0], [0], [0, 0, 1, 0], [], []>} : vector<8x128xf32>, vector<8x128xf32>, vector<8x8xf32> -> vector<8x8xf32>
    %17 = tpu.iota {dimensions = array<i32: 0>} : vector<8x8xi32>
    %18 = vector.broadcast %4 : i32 to vector<8x8xi32>
    %19 = arith.addi %18, %17 : vector<8x8xi32>
    %20 = tpu.iota {dimensions = array<i32: 1>} : vector<8x8xi32>
    %21 = arith.cmpi sle, %20, %19 : vector<8x8xi32>
    %cst_10 = arith.constant -1.000000e+30 : f32
    %22 = vector.broadcast %cst_10 : f32 to vector<8x8xf32>
    %23 = arith.select %21, %16, %22 : vector<8x8xi1>, vector<8x8xf32>
    %cst_11 = arith.constant dense<0xFF800000> : vector<8xf32>
    %24 = vector.multi_reduction <maximumf>, %23, %cst_11 [1] : vector<8x8xf32> to vector<8xf32>
    %25 = vector.shape_cast %24 : vector<8xf32> to vector<8x1xf32>
    %26 = vector.broadcast %25 : vector<8x1xf32> to vector<8x8xf32>
    %27 = arith.subf %23, %26 : vector<8x8xf32>
    %28 = math.exp %27 : vector<8x8xf32>
    %cst_12 = arith.constant dense<0.000000e+00> : vector<8xf32>
    %29 = vector.multi_reduction <add>, %28, %cst_12 [1] : vector<8x8xf32> to vector<8xf32>
    %30 = vector.shape_cast %29 : vector<8xf32> to vector<8x1xf32>
    %c0_13 = arith.constant 0 : index
    %c0_14 = arith.constant 0 : index
    %31 = vector.load %arg11[%c0_13, %c0_14] : memref<8x128xf32, #tpu.memory_space<vmem>>, vector<8x128xf32>
    %cst_15 = arith.constant dense<0.000000e+00> : vector<8x128xf32>
    %32 = tpu.matmul %28, %31, %cst_15 {dimension_numbers = #tpu.dot_dimension_numbers<[1], [0], [0], [1], [0, 0, 1, 1], [], []>} : vector<8x8xf32>, vector<8x128xf32>, vector<8x128xf32> -> vector<8x128xf32>
    %33 = tpu.reciprocal %30 : vector<8x1xf32> -> vector<8x1xf32>
    %34 = vector.broadcast %33 : vector<8x1xf32> to vector<8x128xf32>
    %35 = arith.mulf %32, %34 : vector<8x128xf32>
    %c0_16 = arith.constant 0 : index
    %c0_17 = arith.constant 0 : index
    %36 = vector.load %arg7[%c0_16, %c0_17] : memref<128x128xf32, #tpu.memory_space<vmem>>, vector<128x128xf32>
    %cst_18 = arith.constant dense<0.000000e+00> : vector<8x128xf32>
    %37 = tpu.matmul %35, %36, %cst_18 {dimension_numbers = #tpu.dot_dimension_numbers<[1], [0], [0], [1], [0, 0, 1, 1], [], []>} : vector<8x128xf32>, vector<128x128xf32>, vector<8x128xf32> -> vector<8x128xf32>
    %c0_19 = arith.constant 0 : index
    %c0_20 = arith.constant 0 : index
    %38 = vector.load %arg8[%c0_19, %c0_20] : memref<1x128xf32, #tpu.memory_space<vmem>>, vector<1x128xf32>
    %39 = vector.broadcast %38 : vector<1x128xf32> to vector<8x128xf32>
    %40 = arith.addf %37, %39 : vector<8x128xf32>
    %c0_21 = arith.constant 0 : index
    %c0_22 = arith.constant 0 : index
    %c0_23 = arith.constant 0 : index
    %41 = vector.load %arg9[%c0_21, %c0_22, %c0_23] : memref<1x8x128xf32, #tpu.memory_space<vmem>>, vector<1x8x128xf32>
    %42 = vector.shape_cast %41 : vector<1x8x128xf32> to vector<8x128xf32>
    %43 = vector.shape_cast %40 : vector<8x128xf32> to vector<1x8x128xf32>
    tpu.vector_store %arg9[%c0_21, %c0_22, %c0_23], %43 {strides = array<i32>} : memref<1x8x128xf32, #tpu.memory_space<vmem>>, vector<1x8x128xf32>,
    return
  }
  func.func @transform_0(%arg0: i32, %arg1: i32) -> (i32, i32, i32) {
    %c0_i32 = arith.constant 0 : i32
    %c0_i32_0 = arith.constant 0 : i32
    %c0_i32_1 = arith.constant 0 : i32
    return %arg0, %c0_i32, %c0_i32_0 : i32, i32, i32
  }
  func.func @transform_1(%arg0: i32, %arg1: i32) -> (i32, i32) {
    %c0_i32 = arith.constant 0 : i32
    %c0_i32_0 = arith.constant 0 : i32
    %c0_i32_1 = arith.constant 0 : i32
    return %c0_i32, %c0_i32_0 : i32, i32
  }
  func.func @transform_2(%arg0: i32, %arg1: i32) -> (i32, i32) {
    %c0_i32 = arith.constant 0 : i32
    %c0_i32_0 = arith.constant 0 : i32
    %c0_i32_1 = arith.constant 0 : i32
    return %c0_i32, %c0_i32_0 : i32, i32
  }
  func.func @transform_3(%arg0: i32, %arg1: i32) -> (i32, i32) {
    %c0_i32 = arith.constant 0 : i32
    %c0_i32_0 = arith.constant 0 : i32
    %c0_i32_1 = arith.constant 0 : i32
    return %c0_i32, %c0_i32_0 : i32, i32
  }
  func.func @transform_4(%arg0: i32, %arg1: i32) -> (i32, i32) {
    %c0_i32 = arith.constant 0 : i32
    %c0_i32_0 = arith.constant 0 : i32
    %c0_i32_1 = arith.constant 0 : i32
    return %c0_i32, %c0_i32_0 : i32, i32
  }
  func.func @transform_5(%arg0: i32, %arg1: i32) -> (i32, i32) {
    %c0_i32 = arith.constant 0 : i32
    %c0_i32_0 = arith.constant 0 : i32
    %c0_i32_1 = arith.constant 0 : i32
    return %c0_i32, %c0_i32_0 : i32, i32
  }
  func.func @transform_6(%arg0: i32, %arg1: i32) -> (i32, i32) {
    %c0_i32 = arith.constant 0 : i32
    %c0_i32_0 = arith.constant 0 : i32
    %c0_i32_1 = arith.constant 0 : i32
    return %c0_i32, %c0_i32_0 : i32, i32
  }
  func.func @transform_7(%arg0: i32, %arg1: i32) -> (i32, i32, i32) {
    %c0_i32 = arith.constant 0 : i32
    %c0_i32_0 = arith.constant 0 : i32
    return %arg0, %arg1, %c0_i32 : i32, i32, i32
  }
}

</mosaic_0001>

<bundles_post_ra>
// kernel: tpu_custom_call.1
= control target key start
LH: loop header
LB: loop body
LE: loop exit
PB: predicated region body
PF: predicated region fallthrough
CT: control target
= control target key end

     0   :  { %s1303_s0 = inlined_call_operand.hbm [shape: f32[2,8,128], index: 0, kind: input, shape index: {}]   ;;  %s1304_s1 = inlined_call_operand.hbm [shape: f32[128,128], index: 1, kind: input, shape index: {}]   ;;  %s1305_s2 = inlined_call_operand.vmem [shape: f32[1,128], index: 2, kind: input, shape index: {}]   ;;  %s1306_s3 = inlined_call_operand.hbm [shape: f32[128,256], index: 3, kind: input, shape index: {}]   ;;  %s1307_s4 = inlined_call_operand.vmem [shape: f32[1,256], index: 4, kind: input, shape index: {}]   ;;  %s1308_s5 = inlined_call_operand.hbm [shape: f32[128,128], index: 5, kind: input, shape index: {}]   ;;  %s1309_s6 = inlined_call_operand.vmem [shape: f32[1,128], index: 6, kind: input, shape index: {}]   ;;  %s1310_s7 = inlined_call_operand.hbm [shape: f32[2,8,128], index: 7, kind: output, shape index: {}]  }
   0x1   :  { %1312 = sst [smem:[#allocation17_spill]] %s1304_s1 }
   0x2   :  { %1313 = sst [smem:[#allocation18_spill]] %s1306_s3 }
   0x3   :  { %12 = vsyncpa [#allocation5], 0 }
   0x4   :  { %14 = vsyncpa [#allocation5 + $0x1], 0 }
   0x5   :  { %15 = vsyncpa [#allocation8], 0 }
   0x6   :  { %16 = vsyncpa [#allocation11], 0 }
   0x7   :  { %17 = vsyncpa [#allocation6], 0 }
   0x8   :  { %19 = vsyncpa [#allocation6 + $0x1], 0  ;;  %s1117_s24 = smov 0   ;;  %s1119_s25 = smov 0  }
   0x9   :  { %s1121_s26 = smov 0   ;;  %s1123_s27 = smov 0  }
   0xa   :  { %s1125_s28 = smov 0   ;;  %s1127_s29 = smov 0  }
   0xb LB: > { %s1311_s30 = sadd.s32 4294967295, %s1068_s29   ;;  %p737_p0 = scmp.ge.s32.totalorder %s1068_s29, 1  ;;  %s1068_s29 = sphi %s1127_s29, %s25_s29   ;;  %s1064_s28 = sphi %s1125_s28, %s1328_s28   ;;  %s1060_s27 = sphi %s1123_s27, %s1327_s27   ;;  %s1056_s26 = sphi %s1121_s26, %s1326_s26   ;;  %s1052_s25 = sphi %s1119_s25, %s1325_s25   ;;  %s1048_s24 = sphi %s1117_s24, %s1324_s24  }
   0xc   : > { %p1151_p1 = scmp.eq.s32.totalorder %s1311_s30, 0  ;;  %p222_p2 = scmp.lt.s32.totalorder %s1068_s29, 3 }
   0xd   : > { %s1315_s1 = sld [smem:[#allocation17_spill]]  ;;  %s1070_s13 = smov [#allocation7]  }
   0xe   : > { %p1159_p3 = pnand %p737_p0, %p222_p2  ;;  %s235_s14 = sshll.u32 %s1070_s13, 4  ;;  %s236_s14 = int_to_ptr.vmem [resolvable:$true] %s235_s14 }
   0xf   : > { %p741_p6 = scmp.ge.s32.totalorder %s1068_s29, 2  ;;  %s1318_s3 = sld [smem:[#allocation18_spill]] }
  0x10   : > { %p771_p4 = pneg %p1159_p3  ;;  %s1071_s19 = smov 128  }
  0x11   : > { %s1072_s20 = smov 8   ;;  %s1073_s21 = smov [#allocation9]  }
  0x12   : > { %p1167_p5 = pnand %p771_p4, %p1151_p1  ;;  %s252_s22 = sshll.u32 %s1073_s21, 4  ;;  %s253_s22 = int_to_ptr.vmem [resolvable:$true] %s252_s22 }
  0x13   : > { %s233_s11 = sshll.u32 %s1315_s1, 4  ;;  %s1074_s23 = smov 256   ;;  %s234_s11 = int_to_ptr.hbm [resolvable:$true] %s233_s11 }
  0x14   : > { %774 = dma.hbm_to_vmem [thread:$0]  (!%p1167_p5), %s234_s11, 2048, %s236_s14, [#allocation8], %s1071_s19, %s1071_s19, %s1072_s20  }
  0x15   : > { %s250_s18 = sshll.u32 %s1318_s3, 4  ;;  %s1075_s9 = smov 16   ;;  %s251_s18 = int_to_ptr.hbm [resolvable:$true] %s250_s18 }
  0x16   : > { %777 = dma.hbm_to_vmem [thread:$0]  (!%p1167_p5), %s251_s18, 4096, %s253_s22, [#allocation8], %s1074_s23, %s1074_s23, %s1075_s9  }
  0x17   : > { %s267_s16 = sshll.u32 %s1308_s5, 4  ;;  %s1076_s11 = smov [#allocation10]   ;;  %s268_s16 = int_to_ptr.hbm [resolvable:$true] %s267_s16 }
  0x18   : > { %s269_s14 = sshll.u32 %s1076_s11, 4  ;;  %s736_s17 = sadd.s32 4294967294, %s1068_s29   ;;  %s270_s14 = int_to_ptr.vmem [resolvable:$true] %s269_s14 }
  0x19   : > { %780 = dma.hbm_to_vmem [thread:$0]  (!%p1167_p5), %s268_s16, 2048, %s270_s14, [#allocation11], %s1071_s19, %s1071_s19, %s1072_s20  }
  0x1a   : > { %s37_s21 = sadd.s32 1, %s1064_s28  ;;  %s44_s30 = sadd.s32 1, %s1056_s26 }
  0x1b   : > { %p39_p7 = scmp.ge.s32.totalorder %s37_s21, 2  ;;  %p51_p8 = scmp.ne.s32.totalorder %s1056_s26, %s1052_s25 }
  0x1c   : > { %p52_p9 = scmp.eq.s32.totalorder %s1068_s29, 0  ;;  %p57_p10 = scmp.ne.s32.totalorder %s1052_s25, %s1048_s24 }
  0x1d   : > { %s1330_s21 = smov (%p39_p7, %s37_s21), 0  ;;  %s1321_s20 = sadd.s32 4294967295, %s1068_s29  }
  0x1e   : > { %p1194_p11 = por %p52_p9, %p51_p8  ;;  %p1200_p12 = por %p1151_p1, %p57_p10 }
  0x1f   : > { %s41_s19 = ssub.s32 %s1064_s28, %s1330_s21  ;;  %p209_p13 = scmp.eq.s32.totalorder %s1321_s20, 1 }
  0x20   : > { %p42_p0 = scmp.eq.s32.totalorder %s41_s19, 0  ;;  %p215_p2 = scmp.eq.s32.totalorder %s736_s17, 1 }
  0x21   : > { %p1208_p4 = por %p209_p13, %p51_p8  ;;  %p792_p5 = scmp.lt.s32.totalorder %s1068_s29, 2 }
  0x22   : > { %s1214_s23 = scalar_select %p42_p0, %s1056_s26, %s44_s30  }
  0x23   : > { %p1216_p7 = por %p215_p2, %p57_p10  ;;  %s286_s10 = sand.u32 1, %s1056_s26  }
  0x24   : > { %s742_s13 = sshll.u32 %s286_s10, 3  ;;  %s743_s16 = sshll.u32 %s1064_s28, 3 }
  0x25   : > { %s294_s20 = scalar_lea.hbm %s1303_s0, %s743_s16  ;;  %s290_s19 = scalar_lea.vmem [#allocation4], %s742_s13 }
  0x26   : > { %s298_s17 = sshll.u32 %s290_s19, 4  ;;  %s296_s1 = sshll.u32 %s294_s20, 4  ;;  %s299_s17 = int_to_ptr.vmem [resolvable:$true] %s298_s17  ;;  %s297_s1 = int_to_ptr.hbm [resolvable:$true] %s296_s1 }
  0x27   : > { %p782_p8 = pnand %p792_p5, %p1194_p11  ;;  %s287_s30 = scalar_lea.sflag [#allocation5], %s286_s10 }
  0x28   : > { %307 = sbr.rel (%p1159_p3) target bundleno = 746 (0x2ea), region = 48  ;;  %s1230_s3 = sand.u32 (!%p1159_p3), 1, %s1052_s25  }
  0x29   : > { %784 = dma.hbm_to_vmem [thread:$0]  (!%p782_p8), %s297_s1, 128, %s299_s17, %s287_s30  }
  0x2a   : > { %s745_s16 = sshll.u32 (!%p1159_p3), %s1230_s3, 3  ;;  %s310_s13 = scalar_lea.sflag (!%p1159_p3), [#allocation5], %s1230_s3 }
  0x2b   : > { %s1236_s11 = scalar_lea.vmem (!%p1159_p3), [#allocation4], %s745_s16 }
  0x2d   : > { %1031 = dma.done.wait (%p1200_p12), %s310_s13, 128  }
  0x2e   : > { %1033 = vsyncadd (%p1200_p12), %s310_s13, 4294967168 }
  0x2f   : > { %1035 = dma.done.wait (%p1151_p1), [#allocation8], 6144  }
  0x30   : > { %1037 = vsyncadd (%p1151_p1), [#allocation8], 4294961152 }
  0x31   : > { %1039 = dma.done.wait (%p1151_p1), [#allocation11], 2048  }
  0x32   : > { %1041 = vsyncadd (%p1151_p1), [#allocation11], 4294965248  ;;  %v395_v0 = vld [vmem:[#allocation9 + $0xf0] sm:$0xff]  ;;  %v463_v1 = vld [vmem:[#allocation7 + $0x78] sm:$0xff]  ;;  %v510_v57 = vlaneseq  ;;  %vm518_vm1 = vcmask 64512   ;;  %s752_s15 = sshll.u32 %s1060_s27, 3 }
  0x33   : > { %v393_v2 = vld [vmem:[#allocation9 + $0xe0] sm:$0xff]  ;;  %403 = vmatpush.msra.mxu0 %v395_v0  ;;  %468 = vmatpush.msra.mxu2 %v463_v1  ;;  %v462_v3 = vld [vmem:[#allocation7 + $0x70] sm:$0xff]  ;;  %v461_v5 = vld [vmem:[#allocation7 + $0x68] sm:$0xff]  ;;  %s620_s20 = scalar_lea.hbm %s1310_s7, %s752_s15  ;;  %s359_s30 = scalar_lea.vmem [#allocation12], %s745_s16 }
  0x34   : > { %v391_v4 = vld [vmem:[#allocation9 + $0xd0] sm:$0xff]  ;;  %v389_v6 = vld [vmem:[#allocation9 + $0xc0] sm:$0xff]  ;;  %v459_v9 = vld [vmem:[#allocation7 + $0x58] sm:$0xff]  ;;  %v511_v58 = vshrl.u32 %v510_v57, 7  ;;  %v515_v59 = vand.u32 127, %v510_v57  ;;  %s622_s13 = sshll.u32 %s359_s30, 4  ;;  %s623_s13 = int_to_ptr.vmem [resolvable:$true] %s622_s13 }
  0x35   : > { %404 = vmatpush.msra.mxu0 %v393_v2  ;;  %469 = vmatpush.msra.mxu2 %v462_v3  ;;  %v460_v7 = vld [vmem:[#allocation7 + $0x60] sm:$0xff]  ;;  %v387_v8 = vld [vmem:[#allocation9 + $0xb0] sm:$0xff]  ;;  %v457_v13 = vld [vmem:[#allocation7 + $0x48] sm:$0xff]  ;;  %s609_s1 = scalar_lea.sflag [#allocation6], %s1230_s3  ;;  %s998_s15 = scalar_lea.hbm %s1310_s7, 16 }
  0x36   : > { %v385_v10 = vld [vmem:[#allocation9 + $0xa0] sm:$0xff]  ;;  %v458_v11 = vld [vmem:[#allocation7 + $0x50] sm:$0xff]  ;;  %v455_v17 = vld [vmem:[#allocation7 + $0x38] sm:$0xff]  ;;  %vm516_vm0 = vcmp.le.s32.totalorder %v515_v59, %v511_v58 }
  0x37   : > { %405 = vmatpush.msra.mxu0 %v391_v4  ;;  %470 = vmatpush.msra.mxu2 %v461_v5  ;;  %v383_v12 = vld [vmem:[#allocation9 + $0x90] sm:$0xff]  ;;  %v381_v14 = vld [vmem:[#allocation9 + $0x80] sm:$0xff]  ;;  %v453_v21 = vld [vmem:[#allocation7 + $0x28] sm:$0xff] }
  0x38   : > { %v456_v15 = vld [vmem:[#allocation7 + $0x40] sm:$0xff]  ;;  %v379_v16 = vld [vmem:[#allocation9 + $0x70] sm:$0xff]  ;;  %v451_v25 = vld [vmem:[#allocation7 + $0x18] sm:$0xff] }
  0x39   : > { %406 = vmatpush.msra.mxu0 %v389_v6  ;;  %471 = vmatpush.msra.mxu2 %v460_v7  ;;  %v377_v18 = vld [vmem:[#allocation9 + $0x60] sm:$0xff]  ;;  %v454_v19 = vld [vmem:[#allocation7 + $0x30] sm:$0xff]  ;;  %v449_v29 = vld [vmem:[#allocation7 + $0x8] sm:$0xff] }
  0x3a   : > { %v375_v20 = vld [vmem:[#allocation9 + $0x50] sm:$0xff]  ;;  %v373_v22 = vld [vmem:[#allocation9 + $0x40] sm:$0xff]  ;;  %v396_v33 = vld [vmem:[#allocation9 + $0xf8] sm:$0xff] }
  0x3b   : > { %407 = vmatpush.msra.mxu0 %v387_v8  ;;  %472 = vmatpush.msra.mxu2 %v459_v9  ;;  %v452_v23 = vld [vmem:[#allocation7 + $0x20] sm:$0xff]  ;;  %v371_v24 = vld [vmem:[#allocation9 + $0x30] sm:$0xff]  ;;  %v394_v34 = vld [vmem:[#allocation9 + $0xe8] sm:$0xff] }
  0x3c   : > { %v369_v26 = vld [vmem:[#allocation9 + $0x20] sm:$0xff]  ;;  %v450_v27 = vld [vmem:[#allocation7 + $0x10] sm:$0xff]  ;;  %423 = vmatpush.msra.mxu1 %v396_v33  ;;  %v392_v35 = vld [vmem:[#allocation9 + $0xd8] sm:$0xff] }
  0x3d   : > { %408 = vmatpush.msra.mxu0 %v385_v10  ;;  %473 = vmatpush.msra.mxu2 %v458_v11  ;;  %v367_v28 = vld [vmem:[#allocation9 + $0x10] sm:$0xff]  ;;  %v365_v30 = vld [vmem:[#allocation9] sm:$0xff]  ;;  %v390_v36 = vld [vmem:[#allocation9 + $0xc8] sm:$0xff] }
  0x3e   : > { %v448_v31 = vld [vmem:[#allocation7] sm:$0xff]  ;;  %v364_v32 = vld [vmem:[%s1236_s11] sm:$0xff]  ;;  %424 = vmatpush.msra.mxu1 %v394_v34  ;;  %v386_v38 = vld [vmem:[#allocation9 + $0xa8] sm:$0xff]  ;;  %s624_s11 = sshll.u32 %s620_s20, 4  ;;  %s625_s11 = int_to_ptr.hbm [resolvable:$true] %s624_s11 }
  0x3f   : > { %409 = vmatpush.msra.mxu0 %v383_v12  ;;  %474 = vmatpush.msra.mxu2 %v457_v13  ;;  %v388_v37 = vld [vmem:[#allocation9 + $0xb8] sm:$0xff]  ;;  %v382_v40 = vld [vmem:[#allocation9 + $0x88] sm:$0xff]  ;;  %v397_v42 = vld [vmem:[%s1307_s4] sm:$0x3]  ;;  %s992_s27 = sshra.s32 %s625_s11, 4  ;;  %s993_s27 = int_to_ptr.hbm [resolvable:$true] %s992_s27 }
  0x40   : > { %425 = vmatpush.msra.mxu1 %v392_v35  ;;  %v384_v39 = vld [vmem:[#allocation9 + $0x98] sm:$0xff]  ;;  %v378_v43 = vld [vmem:[#allocation9 + $0x68] sm:$0xff]  ;;  %v399_v44 = vperm.slane %v397_v42, 0  ;;  %v852_v50 = vld [vmem:[%s1305_s2] ss:$0 sm:$0xff]  ;;  %v400_v0 = vperm.slane %v397_v42, 1  ;;  %p999_p10 = scmp.lt.s32.totalorder %s993_s27, %s1310_s7 }
  0x41   : > { %410 = vmatpush.msra.mxu0 %v381_v14  ;;  %475 = vmatpush.msra.mxu2 %v456_v15  ;;  %v380_v41 = vld [vmem:[#allocation9 + $0x78] sm:$0xff]  ;;  %v374_v46 = vld [vmem:[#allocation9 + $0x48] sm:$0xff]  ;;  %v581_v3 = vld [vmem:[#allocation10 + $0x70] sm:$0xff]  ;;  %s994_s8 = scalar_lea.hbm %s993_s27, 8 }
  0x42   : > { %426 = vmatpush.msra.mxu1 %v390_v36  ;;  %v376_v45 = vld [vmem:[#allocation9 + $0x58] sm:$0xff]  ;;  %v370_v51 = vld [vmem:[#allocation9 + $0x28] sm:$0xff]  ;;  %v579_v5 = vld [vmem:[#allocation10 + $0x60] sm:$0xff]  ;;  %p995_p1 = scmp.ne.s32.totalorder %s993_s27, %s994_s8  ;;  %p1000_p11 = scmp.lt.s32.totalorder %s998_s15, %s994_s8 }
  0x43   : > { %411 = vmatpush.msra.mxu0 %v379_v16  ;;  %476 = vmatpush.msra.mxu2 %v455_v17  ;;  %v372_v49 = vld [vmem:[#allocation9 + $0x38] sm:$0xff]  ;;  %v366_v55 = vld [vmem:[#allocation9 + $0x8] sm:$0xff]  ;;  %v577_v7 = vld [vmem:[#allocation10 + $0x50] sm:$0xff] }
  0x44   : > { %427 = vmatpush.msra.mxu1 %v388_v37  ;;  %v368_v52 = vld [vmem:[#allocation9 + $0x18] sm:$0xff]  ;;  %v580_v4 = vld [vmem:[#allocation10 + $0x68] sm:$0xff]  ;;  %v575_v14 = vld [vmem:[#allocation10 + $0x40] sm:$0xff]  ;;  %p996_p3 = pnand %p995_p1, %p1208_p4  ;;  %p1001_p12 = por %p1000_p11, %p999_p10 }
  0x45   : > { %412 = vmatpush.msra.mxu0 %v377_v18  ;;  %477 = vmatpush.msra.mxu2 %v454_v19  ;;  %v582_v2 = vld [vmem:[#allocation10 + $0x78] sm:$0xff]  ;;  %v576_v13 = vld [vmem:[#allocation10 + $0x48] sm:$0xff]  ;;  %v573_v16 = vld [vmem:[#allocation10 + $0x30] sm:$0xff] }
  0x46   : > { %428 = vmatpush.msra.mxu1 %v386_v38  ;;  %v578_v6 = vld [vmem:[#allocation10 + $0x58] sm:$0xff]  ;;  %v572_v17 = vld [vmem:[#allocation10 + $0x28] sm:$0xff]  ;;  %v571_v18 = vld [vmem:[#allocation10 + $0x20] sm:$0xff]  ;;  %p997_p9 = pneg %p996_p3 }
  0x47   : > { %413 = vmatpush.msra.mxu0 %v375_v20  ;;  %478 = vmatpush.msra.mxu2 %v453_v21  ;;  %v574_v15 = vld [vmem:[#allocation10 + $0x38] sm:$0xff]  ;;  %v569_v20 = vld [vmem:[#allocation10 + $0x10] sm:$0xff]  ;;  %v568_v21 = vld [vmem:[#allocation10 + $0x8] sm:$0xff] }
  0x48   : > { %429 = vmatpush.msra.mxu1 %v384_v39  ;;  %v570_v19 = vld [vmem:[#allocation10 + $0x18] sm:$0xff]  ;;  %v853_v36 = vld [vmem:[%s1309_s6] ss:$0 sm:$0xff]  ;;  %p1002_p13 = pnand %p1001_p12, %p997_p9 }
  0x49   : > { %414 = vmatpush.msra.mxu0 %v373_v22  ;;  %479 = vmatpush.msra.mxu2 %v452_v23  ;;  %v567_v22 = vld [vmem:[#allocation10] sm:$0xff] }
  0x4a   : > { %430 = vmatpush.msra.mxu1 %v382_v40 }
  0x4b   : > { %415 = vmatpush.msra.mxu0 %v371_v24  ;;  %480 = vmatpush.msra.mxu2 %v451_v25 }
  0x4c   : > { %431 = vmatpush.msra.mxu1 %v380_v41 }
  0x4d   : > { %416 = vmatpush.msra.mxu0 %v369_v26  ;;  %481 = vmatpush.msra.mxu2 %v450_v27 }
  0x4e   : > { %432 = vmatpush.msra.mxu1 %v378_v43 }
  0x4f   : > { %417 = vmatpush.msra.mxu0 %v367_v28  ;;  %482 = vmatpush.msra.mxu2 %v449_v29 }
  0x50   : > { %433 = vmatpush.msra.mxu1 %v376_v45 }
  0x51   : > { %418 = vmatpush.msra.mxu0 %v365_v30  ;;  %483 = vmatpush.msra.mxu2 %v448_v31 }
  0x52   : > { %419 = vmatmul.f32.vlgmr.msra.gmra.mxu0 %v364_v32  ;;  %484 = vmatmul.f32.vlgmr.msra.gmra.mxu2 %v364_v32 }
  0x53   : > { %434 = vmatpush.msra.mxu1 %v374_v46 }
  0x55   : > { %435 = vmatpush.msra.mxu1 %v372_v49 }
  0x57   : > { %436 = vmatpush.msra.mxu1 %v370_v51 }
  0x59   : > { %437 = vmatpush.msra.mxu1 %v368_v52 }
  0x5b   : > { %438 = vmatpush.msra.mxu1 %v366_v55 }
  0x5c   : > { %439 = vmatmul.f32.vlgmr.msra.gmra.mxu1 %v364_v32 }
  0xcf   : > { %v420_v47 = vpop.f32.mrf.mxu0 }
  0xd0   : > { %v421_v48 = vadd.f32 %v420_v47, %v399_v44 }
  0xd2   : > { %505 = vmatpush.xpose.msrb.mxu0 %v421_v48 }
  0xd5   : > { %v485_v53 = vpop.f32.mrf.mxu2 }
  0xd6   : > { %v486_v54 = vadd.f32 %v852_v50, %v485_v53 }
  0xd8   : > { %v488_v56 = vmul.f32 0.25, %v486_v54 }
  0xd9   : > { %v440_v63 = vpop.f32.mrf.mxu1 }
  0xda   : > { %506 = vmatmul.f32.vlgmr.msrb.gmra.mxu0 %v488_v56  ;;  %v441_v1 = vadd.f32 %v440_v63, %v400_v0 }
  0xdc   : > { %547 = vmatpush.msra.mxu3 %v441_v1 }
  0xde   : > { %587 = vmatpush.msrb.mxu3 %v582_v2 }
  0xe0   : > { %588 = vmatpush.msrb.mxu3 %v581_v3 }
  0xe2   : > { %589 = vmatpush.msrb.mxu3 %v580_v4 }
  0xe4   : > { %590 = vmatpush.msrb.mxu3 %v579_v5 }
  0xe6   : > { %591 = vmatpush.msrb.mxu3 %v578_v6 }
  0xe8   : > { %592 = vmatpush.msrb.mxu3 %v577_v7 }
  0xea   : > { %593 = vmatpush.msrb.mxu3 %v576_v13 }
  0xec   : > { %594 = vmatpush.msrb.mxu3 %v575_v14 }
  0xee   : > { %595 = vmatpush.msrb.mxu3 %v574_v15 }
  0xf0   : > { %596 = vmatpush.msrb.mxu3 %v573_v16 }
  0xf2   : > { %597 = vmatpush.msrb.mxu3 %v572_v17 }
  0xf4   : > { %598 = vmatpush.msrb.mxu3 %v571_v18 }
  0xf6   : > { %599 = vmatpush.msrb.mxu3 %v570_v19 }
  0xf8   : > { %600 = vmatpush.msrb.mxu3 %v569_v20 }
  0xfa   : > { %601 = vmatpush.msrb.mxu3 %v568_v21 }
  0xfc   : > { %602 = vmatpush.msrb.mxu3 %v567_v22 }
 0x157   : > { %v507_v60 = vpop.f32.mrf.mxu0 }
 0x158   : > { %v517_v61 = vsel %vm516_vm0, %v507_v60, -1e+30 }
 0x159   : > { %v519_v62 = vsel %vm518_vm1, %v517_v61, -inf }
 0x15a   : > { %520 = vmax.xlane.f32.xlu0 %v519_v62 }
 0x1cd   : > { %v521_v8 = vpop.xlane.xlu0 %520 }
 0x1ce   : > { %v522_v9 = vsub.f32 %v517_v61, %v521_v8 }
 0x1d0   : > { %v523_v10 = vmul.f32 1.442695, %v522_v9 }
 0x1d2   : > { %854 = vpow2.f32 %v523_v10 }
 0x1d8   : > { %v855_v11 = vpop.eup %854 }
 0x1d9   : > { %750 = vmatmul.msk.f32.vlgmr.msra.gmra.mxu3 %vm518_vm1, %v855_v11  ;;  %v525_v12 = vsel %vm518_vm1, %v855_v11, 0.0 }
 0x1da   : > { %526 = vadd.xlane.f32.xlu0 %v525_v12 }
 0x24d   : > { %v527_v23 = vpop.xlane.xlu0 %526 }
 0x24e   : > { %856 = vrcp.f32 %v527_v23  ;;  %v563_v27 = vand.u32 2147483648, %v527_v23  ;;  %v561_v29 = vand.u32 2147483647, %v527_v23  ;;  %vm557_vm3 = vweird.f32 %v527_v23 }
 0x250   : > { %v564_v31 = vor.u32 1.1754944e-38, %v563_v27  ;;  %vm562_vm5 = vcmp.eq.f32.partialorder %v561_v29, 8.507059e+37 }
 0x254   : > { %v857_v24 = vpop.eup %856 }
 0x255   : > { %v553_v25 = vmul.f32 %v857_v24, %v527_v23  ;;  %vm558_vm2 = vweird.f32 %v857_v24 }
 0x256   : > { %vm559_vm4 = vmor %vm557_vm3, %vm558_vm2 }
 0x257   : > { %v554_v26 = vsub.f32 1.0, %v553_v25 }
 0x259   : > { %v555_v28 = vmul.f32 %v857_v24, %v554_v26 }
 0x25b   : > { %v556_v30 = vadd.f32 %v857_v24, %v555_v28 }
 0x25c   : > { %v549_v33 = vpop.f32.mrf.mxu3 }
 0x25d   : > { %v560_v32 = vsel %vm559_vm4, %v857_v24, %v556_v30 }
 0x25e   : > { %v565_v34 = vsel %vm562_vm5, %v564_v31, %v560_v32 }
 0x25f   : > { %v566_v35 = vmul.f32 %v565_v34, %v549_v33 }
 0x261   : > { %603 = vmatmul.f32.vlgmr.msrb.gmra.mxu3 %v566_v35 }
 0x2e4   : > { %v604_v37 = vpop.f32.mrf.mxu3 }
 0x2e5   : > { %v605_v38 = vadd.f32 %v853_v36, %v604_v37 }
 0x2e7   : > { %607 = vst [vmem:[%s359_s30] sm:$0xff] %v605_v38 }
 0x2e8   : > { %1005 = shalt.err (!%p1002_p13)
}
 0x2e9   : > { %769 = dma.vmem_to_hbm [thread:$0]  (%p1208_p4), %s623_s13, 128, %s625_s11, %s609_s1  }
 0x2ea PF: > { %s636_s3 = sand.u32 1, %s1048_s24   ;;  %p786_p0 = pnand %p741_p6, %p1216_p7 }
 0x2eb   : > { %s637_s14 = scalar_lea.sflag [#allocation6], %s636_s3 }
 0x2ec   : > { %p787_p2 = pneg %p786_p0 }
 0x2ee   : > { %1043 = dma.done.wait (%p787_p2), %s637_s14, 128  }
 0x2ef   : > { %1045 = vsyncadd (%p787_p2), %s637_s14, 4294967168  ;;  %s25_s29 = sadd.s32 1, %s1068_s29   ;;  %s1324_s24 = smov %s1052_s25 }
 0x2f0   : > { %p22_p5 = scmp.ge.s32.totalorder %s25_s29, 4   ;;  %s1325_s25 = smov %s1056_s26 }
 0x2f1   : > { %s1326_s26 = smov %s1214_s23  ;;  %s1327_s27 = smov %s1064_s28 }
 0x2f2   : > { %s1328_s28 = smov %s1330_s21  ;;  %24 = sbr.rel (!%p22_p5) target bundleno = 11 (0xb), region = 110 }
 0x2f7   :  { %643 = vsyncpa [#allocation5], 1 }
 0x2f8   :  { %645 = vsyncpa [#allocation5 + $0x1], 1 }
 0x2f9   :  { %646 = vsyncpa [#allocation8], 1 }
 0x2fa   :  { %647 = vsyncpa [#allocation11], 1 }
 0x2fb   :  { %648 = vsyncpa [#allocation6], 1 }
 0x2fc   :  { %650 = vsyncpa [#allocation6 + $0x1], 1 }

</bundles_post_ra>
